<compile_context>
chip_gen: v5e
topology: v5e:2x2
jax: 0.10.0
libtpu: 0.0.40
codegen_flags: <defaults>
</compile_context>

<pallas_src>
import math
import functools

import jax
import jax.numpy as jnp
from jax.experimental import pallas as pl
from jax.experimental.pallas import tpu as pltpu


_VMEM_LIMIT = 32 * 1024 * 1024  # explicit scoped-VMEM cap; valid on v5e/v6e/v7x


def _pick_row_tile(n_rows, embed_dim, *, target=512, vmem_budget=20 * 1024 * 1024):
    """Rows per grid step.

    Multiple of 8 (sublane tiling), capped so the double-buffered (TM, E) f32
    output block plus one gather scratch stays well under the scoped-VMEM
    budget (tightest on v7x), and shrunk when possible so the grid has at
    least 2 steps (pipelining + v7x megacore sharding).
    """
    n8 = max(8, -(-n_rows // 8) * 8)
    cap = max(8, (vmem_budget // (embed_dim * 4 * 4)) // 8 * 8)
    tm = min(target, cap, n8)
    if n8 // tm < 2 and n8 >= 16:
        tm = max(8, (n8 // 2) // 8 * 8)
    return tm


# ---------------------------------------------------------------------------
# Kernels
# ---------------------------------------------------------------------------

def _la1d_gather_kernel(idx_ref, tab_ref, o_ref, buf_ref, sem_ref, *, rows_per_step):
    # idx_ref: (R,) int32 in SMEM (scalar prefetch); tab_ref: (length, E) in HBM;
    # o_ref: (TM, E) output tile; buf_ref: (TM, E) VMEM scratch; sem_ref: (1,) DMA sem.
    # True gather: DMA only the TM requested rows from HBM into VMEM per tile.
    base = pl.program_id(0) * rows_per_step

    def _copy(r):
        return pltpu.make_async_copy(
            tab_ref.at[pl.ds(idx_ref[base + r], 1), :],
            buf_ref.at[pl.ds(r, 1), :],
            sem_ref.at[0])

    def _start(r, carry):
        _copy(r).start()
        return carry

    jax.lax.fori_loop(0, rows_per_step, _start, 0)

    def _wait(r, carry):
        _copy(r).wait()
        return carry

    jax.lax.fori_loop(0, rows_per_step, _wait, 0)

    o_ref[...] = buf_ref[...].astype(o_ref.dtype)


def _sin1d_kernel(x_ref, params_ref, o_ref):
    # x_ref: (TM, 1) f32 positions.
    # params_ref: (2, E) with row 0 = div (div[k] repeated at lanes 2k, 2k+1)
    #             and row 1 = phase (0 on even lanes, pi/2 on odd lanes).
    # One sin() gives the interleaved pattern:
    #   out[:, 2k] = sin(x*div[k]),  out[:, 2k+1] = cos(x*div[k]).
    div = params_ref[0:1, :]
    phase = params_ref[1:2, :]
    o_ref[...] = jnp.sin(x_ref[...] * div + phase).astype(o_ref.dtype)


def _sin2d_kernel(x_ref, params_ref, o_ref, *, hw, dim):
    # x_ref: (TM, 1) int32 flat spatial index.
    # params_ref: (2, dim) (div / phase for half the channels).
    # First `dim` output channels driven by w = x % hw, last `dim` by h = x // hw.
    div = params_ref[0:1, :]
    phase = params_ref[1:2, :]
    x = x_ref[...]
    pos_w = (x % hw).astype(jnp.float32)
    pos_h = (x // hw).astype(jnp.float32)
    half_w = jnp.sin(pos_w * div + phase)          # (TM, dim)
    half_h = jnp.sin(pos_h * div + phase)          # (TM, dim)
    # Single full-width lane-dense store (unmasked vst when dim % 128 == 0).
    o_ref[...] = jnp.concatenate([half_w, half_h], axis=-1).astype(o_ref.dtype)


# ---------------------------------------------------------------------------
# pallas_call wrappers (grid over flattened row tiles)
# ---------------------------------------------------------------------------

def _la1d_gather(idx_flat, table, tm, out_dtype):
    R = idx_flat.shape[0]
    _, E = table.shape
    kernel = functools.partial(_la1d_gather_kernel, rows_per_step=tm)
    return pl.pallas_call(
        kernel,
        out_shape=jax.ShapeDtypeStruct((R, E), out_dtype),
        grid_spec=pltpu.PrefetchScalarGridSpec(
            num_scalar_prefetch=1,
            grid=(R // tm,),
            in_specs=[pl.BlockSpec(memory_space=pl.ANY)],      # table stays in HBM
            out_specs=pl.BlockSpec((tm, E), lambda g, idx: (g, 0)),
            scratch_shapes=[pltpu.VMEM((tm, E), table.dtype),
                            pltpu.SemaphoreType.DMA((1,))]),
        compiler_params=pltpu.CompilerParams(
            dimension_semantics=("arbitrary",),
            vmem_limit_bytes=_VMEM_LIMIT),
    )(idx_flat, table)


def _run_sin(kernel, rows, params, E, tm, out_dtype):
    # rows: (R, 1); params: grid-invariant (2, E) or (2, E//2).
    R = rows.shape[0]
    return pl.pallas_call(
        kernel,
        out_shape=jax.ShapeDtypeStruct((R, E), out_dtype),
        grid=(R // tm,),
        in_specs=[
            pl.BlockSpec((tm, 1), lambda g: (g, 0)),
            # Tiny grid-invariant block; double-buffer cost is negligible.
            pl.BlockSpec(params.shape, lambda g: (0, 0)),
        ],
        out_specs=pl.BlockSpec((tm, E), lambda g: (g, 0)),
        compiler_params=pltpu.CompilerParams(
            dimension_semantics=("parallel",),
            vmem_limit_bytes=_VMEM_LIMIT),
    )(rows, params)


# ---------------------------------------------------------------------------
# PositionalEmbed (JAX mirror of the PyTorch module)
# ---------------------------------------------------------------------------

class PositionalEmbed:
    def __init__(self, mode="la1d", length=64, embed_dim=1024, key=None,
                 out_dtype=jnp.float32):
        self.mode = mode
        self.length = length
        self.embed_dim = embed_dim
        self.out_dtype = out_dtype   # keep f32 default to match PyTorch numerics

        if mode == "la1d":
            key = jax.random.PRNGKey(0) if key is None else key
            # nn.Parameter(torch.zeros(...)).normal_(0, 0.02)
            self.pos_embed = 0.02 * jax.random.normal(
                key, (length, embed_dim), dtype=jnp.float32)
        elif mode in ("s1d", "ls1d"):
            if embed_dim % 2 != 0:
                raise ValueError("embed_dim must be even for 1D sin/cos")
            dim = embed_dim
            self.div = jnp.exp(
                jnp.arange(0.0, dim, 2, dtype=jnp.float32)
                * -(math.log(10000.0) / dim))                        # (dim//2,)
            div_full = jnp.repeat(self.div, 2)                       # div[k] at 2k, 2k+1
            phase = jnp.tile(jnp.array([0.0, 0.5 * math.pi], jnp.float32), dim // 2)
            self.params = jnp.stack([div_full, phase])               # (2, E)
        elif mode in ("s2d", "ls2d"):
            if embed_dim % 4 != 0:
                raise ValueError("embed_dim must be divisible by 4 for 2D sin/cos")
            self.hw = int(length ** 0.5)
            self.dim = embed_dim // 2
            div = jnp.exp(
                jnp.arange(0.0, self.dim, 2, dtype=jnp.float32)
                * -(math.log(10000.0) / self.dim))                   # (dim//2,)
            self.div = jnp.concatenate([div, div])                   # == div.repeat([2])
            div_full = jnp.repeat(div, 2)                            # (dim,)
            phase = jnp.tile(jnp.array([0.0, 0.5 * math.pi], jnp.float32), self.dim // 2)
            self.params = jnp.stack([div_full, phase])               # (2, dim)
        else:
            raise NotImplementedError
        # TODO(synk): "learnable" only affects whether `div` is a trainable
        # parameter; forward-pass math is identical, so learnable and
        # non-learnable modes share the same kernels here.

    def __call__(self, x):
        if x.ndim == 1:
            x = x[None]
        B, L = x.shape
        E = self.embed_dim
        N = B * L

        tm = _pick_row_tile(N, E)
        R = -(-N // tm) * tm                      # rows padded to a tile multiple
        pad = R - N

        if self.mode == "la1d":
            idx = jnp.pad(x.reshape(N).astype(jnp.int32), (0, pad))   # pad rows gather row 0
            out = _la1d_gather(idx, self.pos_embed, tm, self.out_dtype)
        elif self.mode in ("s1d", "ls1d"):
            rows = jnp.pad(x.reshape(N).astype(jnp.float32), (0, pad))[:, None]
            out = _run_sin(_sin1d_kernel, rows, self.params, E, tm, self.out_dtype)
        else:  # s2d / ls2d
            rows = jnp.pad(x.reshape(N).astype(jnp.int32), (0, pad))[:, None]
            kernel = functools.partial(_sin2d_kernel, hw=self.hw, dim=self.dim)
            out = _run_sin(kernel, rows, self.params, E, tm, self.out_dtype)

        return out[:N].reshape(B, L, E)


# ---------------------------------------------------------------------------
# Pure-JAX references (for verification)
# ---------------------------------------------------------------------------

def _ref_la1d(x, table):
    return table[x.astype(jnp.int32)]


def _ref_s1d(x, div, E):
    ang = x.astype(jnp.float32)[..., None] * div           # (B, L, E//2)
    out = jnp.zeros(x.shape + (E,), jnp.float32)
    out = out.at[:, :, 0:E:2].set(jnp.sin(ang))
    out = out.at[:, :, 1:E:2].set(jnp.cos(ang))
    return out


def _ref_s2d(x, div, E, hw):
    dim = E // 2
    pos_w = (x % hw).astype(jnp.float32)[..., None]
    pos_h = (x // hw).astype(jnp.float32)[..., None]
    out = jnp.zeros(x.shape + (E,), jnp.float32)
    out = out.at[:, :, 0:dim:2].set(jnp.sin(pos_w * div[: dim // 2]))
    out = out.at[:, :, 1:dim:2].set(jnp.cos(pos_w * div[: dim // 2]))
    out = out.at[:, :, dim::2].set(jnp.sin(pos_h * div[dim // 2:]))
    out = out.at[:, :, dim + 1::2].set(jnp.cos(pos_h * div[dim // 2:]))
    return out


# ---------------------------------------------------------------------------
# Main
# ---------------------------------------------------------------------------

if __name__ == "__main__":
    key = jax.random.PRNGKey(0)
    k_tab, k_idx, k_pos = jax.random.split(key, 3)

    B, L = 2, 8
    length, embed_dim = 64, 128   # length is a perfect square -> HW = 8 for 2D

    x_idx = jax.random.randint(k_idx, (B, L), 0, length, dtype=jnp.int32)
    x_pos = jax.random.uniform(k_pos, (B, L), jnp.float32, 0.0, float(length))

    ok = True

    # --- la1d: learned table gather (HBM row gather via scalar prefetch) ---
    mod = PositionalEmbed(mode="la1d", length=length, embed_dim=embed_dim, key=k_tab)
    out = jax.block_until_ready(mod(x_idx))
    ref = _ref_la1d(x_idx, mod.pos_embed)
    ok &= bool(jnp.allclose(out, ref, atol=1e-6, rtol=1e-6))

    # --- ls1d: 1D sinusoidal (sin-with-phase trick) ------------------------
    mod = PositionalEmbed(mode="ls1d", length=length, embed_dim=embed_dim)
    out = jax.block_until_ready(mod(x_pos))
    ref = _ref_s1d(x_pos, mod.div, embed_dim)
    # cos(a) computed as sin(a + pi/2): identical math, a few ulp difference
    # after f32 range reduction -> slightly relaxed tolerance.
    ok &= bool(jnp.allclose(out, ref, atol=1e-4, rtol=1e-4))

    # --- ls2d: 2D sinusoidal ------------------------------------------------
    mod = PositionalEmbed(mode="ls2d", length=length, embed_dim=embed_dim)
    out = jax.block_until_ready(mod(x_idx))
    ref = _ref_s2d(x_idx, mod.div, embed_dim, mod.hw)
    ok &= bool(jnp.allclose(out, ref, atol=1e-4, rtol=1e-4))

    # 1-D input path (unsqueeze to batch)
    out1d = jax.block_until_ready(mod(x_idx[0]))
    ok &= out1d.shape == (1, L, embed_dim)

    if ok:
        print("KERNEL_OK")
    else:
        print("KERNEL_MISMATCH")
</pallas_src>

<mosaic_0001>
module attributes {stable_mosaic.version = 11 : i64} {
  func.func @_la1d_gather_kernel(%arg0: i32, %arg1: memref<16xi32, #tpu.memory_space<smem>>, %arg2: memref<64x128xf32, #tpu.memory_space<any>>, %arg3: memref<8x128xf32, #tpu.memory_space<vmem>>, %arg4: memref<8x128xf32, #tpu.memory_space<vmem>>, %arg5: memref<1x!tpu.dma_semaphore, #tpu.memory_space<semaphore_mem>>) attributes {dimension_semantics = [#tpu.dimension_semantics<arbitrary>], iteration_bounds = array<i64: 2>, scalar_prefetch = 1 : i64, scratch_operands = 2 : i64, tpu.core_type = #tpu.core_type<tc>, window_params = [{}, {transform_indices = @transform_1, window_bounds = array<i64: 8, 128>}]} {
    %c8_i32 = arith.constant 8 : i32
    %0 = arith.muli %arg0, %c8_i32 : i32
    %c0_i32 = arith.constant 0 : i32
    %c8_i32_0 = arith.constant 8 : i32
    %1 = arith.addi %c0_i32, %c8_i32_0 : i32
    %c1_i32 = arith.constant 1 : i32
    scf.for %arg6 = %c0_i32 to %1 step %c1_i32  : i32 {
      %5 = arith.addi %0, %arg6 : i32
      %6 = arith.index_cast %5 : i32 to index
      %7 = memref.load %arg1[%6] : memref<16xi32, #tpu.memory_space<smem>>
      %c0_i32_9 = arith.constant 0 : i32
      %c0_i32_10 = arith.constant 0 : i32
      %8 = tpu.memref_slice %arg2[%7, %c0_i32_10] : memref<64x128xf32, #tpu.memory_space<any>> -> memref<1x128xf32, #tpu.memory_space<any>>
      %c0_i32_11 = arith.constant 0 : i32
      %9 = tpu.memref_slice %arg4[%arg6, %c0_i32_11] : memref<8x128xf32, #tpu.memory_space<vmem>> -> memref<1x128xf32, #tpu.memory_space<vmem>>
      %10 = tpu.memref_slice %arg5[%c0_i32_9] : memref<1x!tpu.dma_semaphore, #tpu.memory_space<semaphore_mem>> -> memref<1x!tpu.dma_semaphore, #tpu.memory_space<semaphore_mem>>
      %11 = tpu.memref_squeeze %10 : memref<1x!tpu.dma_semaphore, #tpu.memory_space<semaphore_mem>> -> memref<!tpu.dma_semaphore, #tpu.memory_space<semaphore_mem>>
      tpu.enqueue_dma source(%8 : memref<1x128xf32, #tpu.memory_space<any>>) target(%9 : memref<1x128xf32, #tpu.memory_space<vmem>>) target_semaphore(%11 : memref<!tpu.dma_semaphore, #tpu.memory_space<semaphore_mem>>)
    }
    %c8_i32_1 = arith.constant 8 : i32
    %c0_i32_2 = arith.constant 0 : i32
    %c8_i32_3 = arith.constant 8 : i32
    %2 = arith.addi %c0_i32_2, %c8_i32_3 : i32
    %c1_i32_4 = arith.constant 1 : i32
    scf.for %arg6 = %c0_i32_2 to %2 step %c1_i32_4  : i32 {
      %5 = arith.addi %0, %arg6 : i32
      %6 = arith.index_cast %5 : i32 to index
      %7 = memref.load %arg1[%6] : memref<16xi32, #tpu.memory_space<smem>>
      %c0_i32_9 = arith.constant 0 : i32
      %c0_i32_10 = arith.constant 0 : i32
      %8 = tpu.memref_slice %arg2[%7, %c0_i32_10] : memref<64x128xf32, #tpu.memory_space<any>> -> memref<1x128xf32, #tpu.memory_space<any>>
      %c0_i32_11 = arith.constant 0 : i32
      %9 = tpu.memref_slice %arg4[%arg6, %c0_i32_11] : memref<8x128xf32, #tpu.memory_space<vmem>> -> memref<1x128xf32, #tpu.memory_space<vmem>>
      %10 = tpu.memref_slice %arg5[%c0_i32_9] : memref<1x!tpu.dma_semaphore, #tpu.memory_space<semaphore_mem>> -> memref<1x!tpu.dma_semaphore, #tpu.memory_space<semaphore_mem>>
      %11 = tpu.memref_squeeze %10 : memref<1x!tpu.dma_semaphore, #tpu.memory_space<semaphore_mem>> -> memref<!tpu.dma_semaphore, #tpu.memory_space<semaphore_mem>>
      tpu.wait_dma2 semaphore(%11 : memref<!tpu.dma_semaphore, #tpu.memory_space<semaphore_mem>>) src(%8 : memref<1x128xf32, #tpu.memory_space<any>>) dst(%9 : memref<1x128xf32, #tpu.memory_space<vmem>>)
    }
    %c8_i32_5 = arith.constant 8 : i32
    %c0 = arith.constant 0 : index
    %c0_6 = arith.constant 0 : index
    %3 = vector.load %arg4[%c0, %c0_6] : memref<8x128xf32, #tpu.memory_space<vmem>>, vector<8x128xf32>
    %c0_7 = arith.constant 0 : index
    %c0_8 = arith.constant 0 : index
    %4 = vector.load %arg3[%c0_7, %c0_8] : memref<8x128xf32, #tpu.memory_space<vmem>>, vector<8x128xf32>
    tpu.vector_store %arg3[%c0_7, %c0_8], %3 {strides = array<i32>} : memref<8x128xf32, #tpu.memory_space<vmem>>, vector<8x128xf32>,
    return
  }
  func.func @transform_1(%arg0: i32, %arg1: memref<16xi32, #tpu.memory_space<smem>>) -> (i32, i32) {
    %c0_i32 = arith.constant 0 : i32
    %c0_i32_0 = arith.constant 0 : i32
    return %arg0, %c0_i32 : i32, i32
  }
}

</mosaic_0001>

<bundles_post_ra>
// kernel: tpu_custom_call.1
= control target key start
LH: loop header
LB: loop body
LE: loop exit
PB: predicated region body
PF: predicated region fallthrough
CT: control target
= control target key end

     0   :  { %s340_s12 = smov [#allocation5]   ;;  %s460_s0 = inlined_call_operand.hbm [shape: s32[16], index: 0, kind: input, shape index: {}]   ;;  %s461_s1 = inlined_call_operand.hbm [shape: f32[64,128], index: 1, kind: input, shape index: {}]   ;;  %s462_s2 = inlined_call_operand.hbm [shape: f32[16,128], index: 2, kind: output, shape index: {}]  }
   0x1   :  { %s8_s11 = sshll.u32 %s460_s0, 4  ;;  %s9_s11 = int_to_ptr.hbm [resolvable:$true] %s8_s11 }
   0x2   :  { %11 = dma.hbm_to_smem %s9_s11, 16, %s340_s12, [#allocation4] }
   0x3   :  { %312 = dma.done.wait [#allocation4], 16 }
   0x4   :  { %313 = vsyncadd [#allocation4], 4294967280 }
   0x5   :  { %14 = sfence }
   0x6   :  { %15 = vsyncpa [#allocation7], 0 }
   0x7   :  { %17 = vsyncpa [#allocation7 + $0x1], 0  ;;  %s360_s13 = smov 0   ;;  %s362_s14 = smov 0  }
   0x8   :  { %s364_s15 = smov 0  }
   0x9 LB: > { %s170_s0 = sadd.s32 4294967295, %s330_s15   ;;  %s377_s16 = sadd.s32 1, %s330_s15   ;;  %s330_s15 = sphi %s364_s15, %s467_s15   ;;  %s326_s14 = sphi %s362_s14, %s466_s14   ;;  %s322_s13 = sphi %s360_s13, %s465_s13  }
   0xa   : > { %s26_s17 = ssub.s32 %s330_s15, %s377_s16  ;;  %s29_s18 = sadd.s32 1, %s326_s14 }
   0xb   : > { %p27_p0 = scmp.eq.s32.totalorder %s26_s17, 0  ;;  %p171_p1 = scmp.ne.s32.totalorder %s26_s17, 0 }
   0xc   : > { %p33_p2 = scmp.eq.s32.totalorder %s330_s15, 1  ;;  %p38_p3 = scmp.ne.s32.totalorder %s326_s14, %s322_s13 }
   0xd   : > { %s386_s19 = scalar_select %p27_p0, %s326_s14, %s29_s18  }
   0xe   : > { %p388_p4 = por %p171_p1, %p33_p2  ;;  %p39_p5 = scmp.eq.s32.totalorder %s170_s0, 1 }
   0xf   : > { %p172_p7 = scmp.ge.s32.totalorder %s330_s15, 2 }
  0x10   : > { %p392_p6 = por %p39_p5, %p38_p3  ;;  %s53_s22 = sand.u32 (!%p172_p7), 1, %s326_s14  }
  0x11   : > { %48 = sbr.rel (%p172_p7) target bundleno = 76 (0x4c), region = 12  ;;  %s174_s23 = sshll.u32 (!%p172_p7), %s330_s15, 3 }
  0x12   : > { %s401_s24 = sshll.u32 (!%p172_p7), %s53_s22, 3  ;;  %s404_s26 = smov (!%p172_p7), 0  }
  0x13   : > { %s55_s25 = scalar_lea.vmem (!%p172_p7), [#allocation6], %s401_s24 }
  0x16 LB: >> { %s63_s27 = sadd.s32 %s334_s26, %s174_s23  ;;  %s66_s29 = scalar_lea.vmem [#allocation2], %s334_s26  ;;  %s334_s26 = sphi %s404_s26, %s62_s26  }
  0x17   : >> { %s64_s28 = sld [smem:[#allocation5 + %s63_s27]]  ;;  %s76_s30 = sshll.u32 %s66_s29, 4  ;;  %s77_s30 = int_to_ptr.vmem [resolvable:$true] %s76_s30 }
  0x18   : >> { %s244_s11 = scalar_lea.hbm %s461_s1, 64 }
  0x1d   : >> { %s65_s5 = scalar_lea.hbm %s461_s1, %s64_s28 }
  0x1e   : >> { %s74_s6 = sshll.u32 %s65_s5, 4  ;;  %s75_s6 = int_to_ptr.hbm [resolvable:$true] %s74_s6 }
  0x1f   : >> { %s240_s7 = sshra.s32 %s75_s6, 4  ;;  %s241_s7 = int_to_ptr.hbm [resolvable:$true] %s240_s7 }
  0x20   : >> { %s242_s8 = scalar_lea.hbm %s241_s7, 1  ;;  %p245_p9 = scmp.lt.s32.totalorder %s241_s7, %s461_s1 }
  0x21   : >> { %p243_p8 = scmp.ne.s32.totalorder %s241_s7, %s242_s8  ;;  %p246_p10 = scmp.lt.s32.totalorder %s244_s11, %s242_s8 }
  0x23   : >> { %p247_p11 = por %p246_p10, %p245_p9 }
  0x25   : >> { %p248_p12 = pnand %p247_p11, %p243_p8 }
  0x27   : >> { %251 = shalt.err (!%p248_p12)  }
  0x28   : >> { %s252_s17 = sshra.s32 %s77_s30, 4  ;;  %s341_s27 = smov [#allocation2]   ;;  %s253_s17 = int_to_ptr.vmem [resolvable:$true] %s252_s17 }
  0x29   : >> { %s254_s18 = scalar_lea.vmem %s253_s17, 1  ;;  %s256_s28 = scalar_lea.vmem %s341_s27, 8 }
  0x2a   : >> { %p255_p13 = scmp.ne.s32.totalorder %s253_s17, %s254_s18  ;;  %p257_p0 = scmp.lt.s32.totalorder %s253_s17, [#allocation2] }
  0x2b   : >> { %p258_p1 = scmp.lt.s32.totalorder %s256_s28, %s254_s18 }
  0x2d   : >> { %p259_p2 = por %p258_p1, %p257_p0 }
  0x2f   : >> { %p260_p3 = pnand %p259_p2, %p255_p13 }
  0x31   : >> { %263 = shalt.err (!%p260_p3)  }
  0x32   : >> { %79 = dma.hbm_to_vmem [thread:$0]  %s75_s6, 16, %s77_s30, [#allocation3] }
  0x33   : >> { %s62_s26 = sadd.s32 1, %s334_s26  }
  0x34   : >> { %p59_p5 = scmp.ge.s32.totalorder %s62_s26, 8  }
  0x35   : > { %s336_s29 = smov (%p59_p5), 0  }
  0x36   : > { %61 = sbr.rel (!%p59_p5) target bundleno = 22 (0x16), region = 64 }
  0x3b LB: >> { %314 = dma.done.wait [#allocation3], 16  ;;  %s338_s29 = sphi %s336_s29, %s85_s29  }
  0x3c   : >> { %315 = vsyncadd [#allocation3], 4294967280  ;;  %s85_s29 = sadd.s32 1, %s338_s29  }
  0x3d   : >> { %p82_p7 = scmp.ge.s32.totalorder %s85_s29, 8  }
  0x3e   : > { %v91_v0 = vld [vmem:[#allocation2] sm:$0xff] (%p82_p7)  ;;  %s104_s26 = scalar_lea.hbm (%p82_p7), %s462_s2, %s174_s23  ;;  %s106_s4 = sshll.u32 (%p82_p7), %s55_s25, 4  ;;  %s107_s4 = int_to_ptr.vmem [resolvable:$true] %s106_s4 }
  0x3f   : > { %84 = sbr.rel (!%p82_p7) target bundleno = 59 (0x3b), region = 75  ;;  %92 = vst [vmem:[%s55_s25] sm:$0xff] (%p82_p7), %v91_v0  ;;  %s108_s5 = sshll.u32 (%p82_p7), %s104_s26, 4  ;;  %s109_s5 = int_to_ptr.hbm [resolvable:$true] %s108_s5 }
  0x40   : > { %s94_s6 = scalar_lea.sflag (%p82_p7), [#allocation7], %s53_s22  ;;  %s278_s7 = sshra.s32 (%p82_p7), %s109_s5, 4  ;;  %s279_s7 = int_to_ptr.hbm [resolvable:$true] %s278_s7 }
  0x41   : > { %s280_s8 = scalar_lea.hbm (%p82_p7), %s279_s7, 8  ;;  %s284_s23 = scalar_lea.hbm (%p82_p7), %s462_s2, 16 }
  0x42   : > { %p281_p8 = scmp.ne.s32.totalorder (%p82_p7), %s279_s7, %s280_s8  ;;  %p285_p11 = scmp.lt.s32.totalorder (%p82_p7), %s279_s7, %s462_s2 }
  0x43   : > { %p286_p12 = scmp.lt.s32.totalorder (%p82_p7), %s284_s23, %s280_s8 }
  0x44   : > { %p282_p9 = pnand %p281_p8, %p388_p4 }
  0x45   : > { %p287_p13 = por %p286_p12, %p285_p11 }
  0x46   : > { %p283_p10 = pneg %p282_p9 }
  0x48   : > { %p288_p0 = pnand %p287_p13, %p283_p10 }
  0x4a   : > { %291 = shalt.err (!%p288_p0)
}
  0x4b   : > { %180 = dma.vmem_to_hbm [thread:$0]  (%p388_p4), %s107_s4, 128, %s109_s5, %s94_s6  }
  0x4c PF: > { %p186_p1 = scmp.ge.s32.totalorder %s330_s15, 1  ;;  %s120_s22 = sand.u32 1, %s322_s13  }
  0x4d   : > { %s121_s24 = scalar_lea.sflag [#allocation7], %s120_s22 }
  0x4e   : > { %p183_p2 = pnand %p186_p1, %p392_p6 }
  0x50   : > { %p184_p3 = pneg %p183_p2 }
  0x52   : > { %317 = dma.done.wait (%p184_p3), %s121_s24, 128  }
  0x53   : > { %319 = vsyncadd (%p184_p3), %s121_s24, 4294967168  ;;  %p20_p5 = scmp.ge.s32.totalorder %s377_s16, 3   ;;  %s465_s13 = smov %s326_s14 }
  0x54   : > { %s466_s14 = smov %s386_s19  ;;  %s467_s15 = smov %s377_s16 }
  0x55   :  { %22 = sbr.rel (!%p20_p5) target bundleno = 9 (0x9), region = 86 }
  0x5a   :  { %127 = vsyncpa [#allocation7], 1 }
  0x5b   :  { %129 = vsyncpa [#allocation7 + $0x1], 1 }
  0x5c   :  { %130 = vsyncmov [#allocation3] }
  0x5f   :  { %s131_s15 = vpop.sfrf %130 }
  0x60   :  { %p179_p4 = scmp.ne.s32.totalorder %s131_s15, 0 }
  0x62   :  { %135 = shalt.err (%p179_p4)  }

</bundles_post_ra>
